<compile_context>
chip_gen: v6e
topology: v6e:2x2x1
jax: 0.10.0
libtpu: 0.0.40
codegen_flags: <defaults>
</compile_context>

<pallas_src>
import jax
import jax.numpy as jnp
from jax.experimental import pallas as pl
from jax.experimental.pallas import tpu as pltpu

_LOG10E = 0.43429448190325176  # 1 / ln(10)


def _normalize_db_kernel(params_ref, x_ref, o_ref):
    # params (SMEM, f32[4]): [scale, offset, clip_lo, clip_hi]
    scale = params_ref[0]
    offset = params_ref[1]
    lo = params_ref[2]
    hi = params_ref[3]

    x = jnp.maximum(x_ref[...].astype(jnp.float32), jnp.float32(1e-5))
    y = offset + scale * jnp.log(x)          # EUP ln + one VPU mul-add
    o_ref[...] = jnp.clip(y, lo, hi).astype(o_ref.dtype)


def _round_up(v, m):
    return -(-v // m) * m


def _pick_tiles(n_mels, time):
    # Mel axis (sublane dim): full dim is always a legal block size; only tile
    # if it gets large (tile must then be a multiple of 8 -> ragged last block
    # is handled by Pallas).
    tile_m = n_mels if n_mels <= 256 else 256
    # Time axis (lane dim): multiples of 128, aim for >= 2 blocks so both v7x
    # TensorCores get work; cap block width at 2048 lanes (~1 MiB f32 rows).
    if time <= 128:
        tile_t = time
    else:
        tile_t = min(2048, _round_up(pl.cdiv(time, 2), 128))
    return tile_m, tile_t


@jax.jit
def _normalize_db_call(specgram, params):
    assert specgram.ndim == 3 and specgram.shape[0] == 1, \
        "squeeze(0) requires leading dim 1"
    _, n_mels, time = specgram.shape
    tile_m, tile_t = _pick_tiles(n_mels, time)
    grid = (pl.cdiv(n_mels, tile_m), pl.cdiv(time, tile_t))

    return pl.pallas_call(
        _normalize_db_kernel,
        out_shape=jax.ShapeDtypeStruct((n_mels, time), specgram.dtype),
        grid=grid,
        in_specs=[
            pl.BlockSpec(memory_space=pltpu.MemorySpace.SMEM),   # params
            pl.BlockSpec((pl.Squeezed(), tile_m, tile_t),        # spectrogram
                         lambda i, j: (0, i, j)),
        ],
        out_specs=pl.BlockSpec((tile_m, tile_t), lambda i, j: (i, j)),
        compiler_params=pltpu.CompilerParams(
            dimension_semantics=("parallel", "parallel")),
    )(params, specgram)


def normalize_db(specgram, *, min_level_db=-100.0, normalization=True):
    """specgram: [1, n_mels, time] -> [n_mels, time] (input dtype preserved)."""
    assert float(min_level_db) != 0.0, "min_level_db must be non-zero"
    # Fold all scalar arithmetic into one mul-add + clip:
    #   (min_db - 20*log10(x)) / min_db == 1 + (-20*log10e/min_db) * ln(x)
    if normalization:
        scale = -20.0 * _LOG10E / float(min_level_db)
        offset, lo, hi = 1.0, 0.0, 1.0
    else:
        scale, offset = _LOG10E, 0.0
        lo, hi = -float("inf"), float("inf")
    params = jnp.array([scale, offset, lo, hi], dtype=jnp.float32)
    return _normalize_db_call(specgram, params)


def _ref_normalize_db(specgram, min_level_db, normalization):
    x = jnp.maximum(specgram[0].astype(jnp.float32), 1e-5)
    logspec = jnp.log10(x)
    if normalization:
        return jnp.clip((min_level_db - 20.0 * logspec) / min_level_db, 0.0, 1.0)
    return logspec


if __name__ == "__main__":
    min_level_db = -100.0
    key = jax.random.PRNGKey(0)
    k1, k2, k3, k4 = jax.random.split(key, 4)

    # Case 1: small, (8,128)-aligned spectrogram.
    x1 = jax.random.uniform(k1, (1, 16, 256), dtype=jnp.float32,
                            minval=0.0, maxval=2.0)
    # Case 2: unaligned dims -> ragged trailing blocks on both axes.
    x2 = jax.random.uniform(k2, (1, 20, 300), dtype=jnp.float32,
                            minval=0.0, maxval=4.0)
    # Case 3: typical WaveRNN mel spectrogram, multi-block along time.
    x3 = jax.random.uniform(k3, (1, 80, 1000), dtype=jnp.float32,
                            minval=0.0, maxval=8.0)

    for x in (x1, x2, x3):
        for norm in (True, False):
            out = jax.block_until_ready(
                normalize_db(x, min_level_db=min_level_db, normalization=norm))
            ref = _ref_normalize_db(x, min_level_db, norm)
            assert out.shape == x.shape[1:] and out.dtype == x.dtype
            assert jnp.allclose(out, ref, atol=1e-5, rtol=1e-5), (x.shape, norm)

    # Case 4: bf16 I/O (half the HBM bytes); math runs in f32 inside the kernel.
    x4 = jax.random.uniform(k4, (1, 80, 512), dtype=jnp.float32,
                            minval=0.0, maxval=4.0).astype(jnp.bfloat16)
    out4 = jax.block_until_ready(
        normalize_db(x4, min_level_db=min_level_db, normalization=True))
    ref4 = _ref_normalize_db(x4, min_level_db, True)
    assert out4.shape == x4.shape[1:] and out4.dtype == jnp.bfloat16
    assert jnp.allclose(out4.astype(jnp.float32), ref4, atol=1e-2, rtol=1e-2)

    print("KERNEL_OK")
</pallas_src>

<mosaic_0001>
module attributes {stable_mosaic.version = 11 : i64} {
  func.func @_normalize_db_kernel(%arg0: i32, %arg1: i32, %arg2: memref<4xf32, #tpu.memory_space<smem>>, %arg3: memref<1x16x128xf32, #tpu.memory_space<vmem>>, %arg4: memref<16x128xf32, #tpu.memory_space<vmem>>) attributes {dimension_semantics = [#tpu.dimension_semantics<parallel>, #tpu.dimension_semantics<parallel>], iteration_bounds = array<i64: 1, 2>, scalar_prefetch = 0 : i64, scratch_operands = 0 : i64, tpu.core_type = #tpu.core_type<tc>, window_params = [{transform_indices = @transform_0, window_bounds = array<i64: 4>}, {transform_indices = @transform_1, window_bounds = array<i64: 1, 16, 128>}, {transform_indices = @transform_2, window_bounds = array<i64: 16, 128>}]} {
    %c0 = arith.constant 0 : index
    %0 = memref.load %arg2[%c0] : memref<4xf32, #tpu.memory_space<smem>>
    %c1 = arith.constant 1 : index
    %1 = memref.load %arg2[%c1] : memref<4xf32, #tpu.memory_space<smem>>
    %c2 = arith.constant 2 : index
    %2 = memref.load %arg2[%c2] : memref<4xf32, #tpu.memory_space<smem>>
    %c3 = arith.constant 3 : index
    %3 = memref.load %arg2[%c3] : memref<4xf32, #tpu.memory_space<smem>>
    %c0_0 = arith.constant 0 : index
    %c0_1 = arith.constant 0 : index
    %c0_2 = arith.constant 0 : index
    %4 = vector.load %arg3[%c0_0, %c0_1, %c0_2] : memref<1x16x128xf32, #tpu.memory_space<vmem>>, vector<1x16x128xf32>
    %5 = vector.shape_cast %4 : vector<1x16x128xf32> to vector<16x128xf32>
    %cst = arith.constant 9.99999974E-6 : f32
    %6 = vector.broadcast %cst : f32 to vector<16x128xf32>
    %7 = arith.maximumf %5, %6 : vector<16x128xf32>
    %8 = math.log %7 : vector<16x128xf32>
    %9 = vector.broadcast %0 : f32 to vector<16x128xf32>
    %10 = arith.mulf %9, %8 : vector<16x128xf32>
    %11 = vector.broadcast %1 : f32 to vector<16x128xf32>
    %12 = arith.addf %11, %10 : vector<16x128xf32>
    %13 = vector.broadcast %2 : f32 to vector<16x128xf32>
    %14 = arith.maximumf %13, %12 : vector<16x128xf32>
    %15 = vector.broadcast %3 : f32 to vector<16x128xf32>
    %16 = arith.minimumf %15, %14 : vector<16x128xf32>
    %c0_3 = arith.constant 0 : index
    %c0_4 = arith.constant 0 : index
    %17 = vector.load %arg4[%c0_3, %c0_4] : memref<16x128xf32, #tpu.memory_space<vmem>>, vector<16x128xf32>
    tpu.vector_store %arg4[%c0_3, %c0_4], %16 {strides = array<i32>} : memref<16x128xf32, #tpu.memory_space<vmem>>, vector<16x128xf32>,
    return
  }
  func.func @transform_0(%arg0: i32, %arg1: i32) -> i32 {
    %c0_i32 = arith.constant 0 : i32
    %c0_i32_0 = arith.constant 0 : i32
    return %c0_i32 : i32
  }
  func.func @transform_1(%arg0: i32, %arg1: i32) -> (i32, i32, i32) {
    %c0_i32 = arith.constant 0 : i32
    %c0_i32_0 = arith.constant 0 : i32
    return %c0_i32, %arg0, %arg1 : i32, i32, i32
  }
  func.func @transform_2(%arg0: i32, %arg1: i32) -> (i32, i32) {
    %c0_i32 = arith.constant 0 : i32
    return %arg0, %arg1 : i32, i32
  }
}

</mosaic_0001>

<bundles_post_ra>
// kernel: _normalize_db_call.1
= control target key start
LH: loop header
LB: loop body
LE: loop exit
PB: predicated region body
PF: predicated region fallthrough
CT: control target
= control target key end

     0   :  { %7 = vsyncpa [#allocation5], 0  ;;  %s772_s0 = inlined_call_operand.vmem [shape: f32[4], index: 0, kind: input, shape index: {}]   ;;  %s773_s1 = inlined_call_operand.hbm [shape: f32[1,16,256], index: 1, kind: input, shape index: {}]   ;;  %s774_s2 = inlined_call_operand.hbm [shape: f32[16,256], index: 2, kind: output, shape index: {}]  }
   0x1   :  { %8 = vsyncpa [#allocation3], 0 }
   0x2   :  { %10 = vsyncpa [#allocation3 + $0x1], 0 }
   0x3   :  { %11 = vsyncpa [#allocation4], 0 }
   0x4   :  { %13 = vsyncpa [#allocation4 + $0x1], 0  ;;  %s589_s9 = smov 0   ;;  %s591_s10 = smov 0  }
   0x5   :  { %s593_s11 = smov 0   ;;  %s595_s12 = smov 0  }
   0x6   :  { %s597_s13 = smov 0   ;;  %s599_s14 = smov 0  }
   0x7 LB: > { %s335_s15 = sadd.s32 4294967295, %s563_s14   ;;  %s336_s16 = sadd.s32 4294967294, %s563_s14   ;;  %s563_s14 = sphi %s599_s14, %s19_s14   ;;  %s559_s13 = sphi %s597_s13, %s792_s13   ;;  %s555_s12 = sphi %s595_s12, %s791_s12   ;;  %s551_s11 = sphi %s593_s11, %s790_s11   ;;  %s547_s10 = sphi %s591_s10, %s789_s10   ;;  %s543_s9 = sphi %s589_s9, %s788_s9  }
   0x8   : > { %s61_s17 = sadd.s32 1, %s551_s11  ;;  %p68_p0 = scmp.ne.s32.totalorder %s551_s11, %s547_s10 }
   0x9   : > { %p69_p1 = scmp.eq.s32.totalorder %s563_s14, 0  ;;  %p74_p2 = scmp.ne.s32.totalorder %s547_s10, %s543_s9 }
   0xa   : > { %p627_p3 = scmp.eq.s32.totalorder %s335_s15, 0  ;;  %p100_p4 = scmp.eq.s32.totalorder %s335_s15, 1 }
   0xb   : > { %p631_p5 = por %p69_p1, %p68_p0  ;;  %p106_p6 = scmp.eq.s32.totalorder %s336_s16, 1 }
   0xc   : > { %p637_p7 = por %p627_p3, %p74_p2  ;;  %p641_p8 = por %p100_p4, %p68_p0 }
   0xd   : > { %p645_p9 = por %p106_p6, %p74_p2  ;;  %p337_p10 = scmp.ge.s32.totalorder %s563_s14, 1 }
   0xe   : > { %s779_s21 = scalar_select %p641_p8, 1, 0 }
   0xf   : > { %s780_s22 = scalar_select %p645_p9, 1, 0 }
  0x10   : > { %p113_p11 = scmp.lt.s32.totalorder %s563_s14, 3  ;;  %s126_s25 = sshll.u32 %s772_s0, 4  ;;  %s127_s25 = int_to_ptr.vmem [resolvable:$true] %s126_s25 }
  0x11   : > { %p374_p0 = scmp.lt.s32.totalorder %s563_s14, 2  ;;  %s28_s29 = sadd.s32 1, %s559_s13 }
  0x12   : > { %p654_p12 = pnand %p337_p10, %p113_p11  ;;  %p675_p6 = scmp.ge.s32.totalorder %s28_s29, 2 }
  0x13   : > { %p664_p2 = pnand %p374_p0, %p631_p5  ;;  %s137_s3 = sand.u32 1, %s551_s11  }
  0x14   : > { %p361_p1 = pneg %p654_p12  ;;  %s436_s4 = scalar_lea.vmem %s127_s25, 16 }
  0x15   : > { %p437_p10 = scmp.ne.s32.totalorder %s127_s25, %s436_s4  ;;  %p444_p13 = scmp.lt.s32.totalorder %s127_s25, %s127_s25 }
  0x16   : > { %p670_p4 = pnand %p361_p1, %p627_p3  ;;  %p445_p9 = scmp.lt.s32.totalorder %s436_s4, %s436_s4 }
  0x18   : > { %p438_p11 = pneg %p670_p4  ;;  %p446_p8 = por %p445_p9, %p444_p13 }
  0x1a   : > { %p439_p5 = pnand %p438_p11, %p437_p10 }
  0x1c   : > { %p440_p0 = pneg %p439_p5 }
  0x1e   : > { %p447_p1 = pnand %p446_p8, %p440_p0 }
  0x20   : > { %450 = shalt.err (!%p447_p1)
}
  0x21   : > { %s565_s5 = smov [#allocation2]   ;;  %s794_s29 = smov (%p675_p6, %s28_s29), 0 }
  0x22   : > { %364 = dma.vmem_to_smem (!%p670_p4), %s127_s25, 16, %s565_s5, [#allocation5]  }
  0x23   : > { %s340_s6 = sshll.u32 %s137_s3, 4  ;;  %s57_s7 = ssub.s32 %s559_s13, %s794_s29 }
  0x24   : > { %p59_p10 = scmp.eq.s32.totalorder %s57_s7, 0  ;;  %s341_s8 = sshll.u32 %s559_s13, 7 }
  0x25   : > { %s149_s19 = scalar_lea.hbm %s773_s1, %s341_s8  ;;  %s141_s23 = scalar_lea.vmem [#allocation6], %s340_s6 }
  0x26   : > { %s150_s24 = sshll.u32 %s141_s23, 4  ;;  %s138_s4 = scalar_lea.sflag [#allocation3], %s137_s3  ;;  %s151_s24 = int_to_ptr.vmem [resolvable:$true] %s150_s24 }
  0x27   : > { %s697_s28 = scalar_select %p59_p10, %s551_s11, %s61_s17  }
  0x28   : > { %p453_p8 = pneg %p664_p2  ;;  %s464_s25 = scalar_lea.vmem %s151_s24, 256 }
  0x29   : > { %p465_p9 = scmp.ne.s32.totalorder %s151_s24, %s464_s25  ;;  %s566_s30 = smov [#allocation6]  }
  0x2a   : > { %s469_s5 = sshll.u32 %s566_s30, 4  ;;  %s470_s5 = int_to_ptr.vmem [resolvable:$false] %s469_s5 }
  0x2b   : > { %p467_p13 = pnand %p465_p9, %p453_p8  ;;  %s471_s7 = scalar_lea.vmem %s470_s5, 512 }
  0x2c   : > { %p472_p6 = scmp.lt.s32.totalorder %s151_s24, %s470_s5  ;;  %p473_p11 = scmp.lt.s32.totalorder %s471_s7, %s464_s25 }
  0x2d   : > { %p468_p4 = pneg %p467_p13 }
  0x2e   : > { %p474_p5 = por %p473_p11, %p472_p6 }
  0x30   : > { %p475_p0 = pnand %p474_p5, %p468_p4 }
  0x32   : > { %478 = shalt.err (!%p475_p0)
}
  0x33   : > { %s567_s6 = smov 256   ;;  %s568_s17 = smov 128  }
  0x34   : > { %s569_s8 = smov 8   ;;  %162 = sbr.rel (%p654_p12) target bundleno = 107 (0x6b), region = 28 }
  0x35   : > { %368 = dma.hbm_to_vmem [thread:$0]  (!%p664_p2), %s149_s19, 256, %s151_s24, %s138_s4, %s567_s6, %s568_s17, %s569_s8  }
  0x39   : > { %530 = dma.done.wait (%p627_p3), [#allocation5], 16  }
  0x3a   : > { %532 = vsyncadd (%p627_p3), [#allocation5], 4294967280  ;;  %s710_s3 = sand.u32 1, %s547_s10  }
  0x3b   : > { %s344_s15 = sshll.u32 %s710_s3, 4  ;;  %s169_s16 = scalar_lea.sflag [#allocation3], %s710_s3 }
  0x3c   : > { %s172_s23 = scalar_lea.vmem [#allocation6], %s344_s15 }
  0x3d   : > { %534 = dma.done.wait (%p637_p7), %s169_s16, 256  }
  0x3e   : > { %536 = vsyncadd (%p637_p7), %s169_s16, 4294967040 }
  0x3f   : > { %177 = sfence }
  0x40   : > { %v200_v0 = vld [vmem:[%s172_s23] sm:$0xff]  ;;  %v201_v1 = vld [vmem:[%s172_s23 + $0x8] sm:$0xff]  ;;  %s196_s18 = sld [smem:[#allocation2]]  ;;  %s193_s20 = scalar_lea.vmem [#allocation7], %s344_s15 }
  0x41   : > { %v202_v2 = vmax.f32 %v200_v0, 1e-05  ;;  %v203_v3 = vmax.f32 %v201_v1, 1e-05  ;;  %s346_s26 = sld [smem:[#allocation2 + $0x1]]  ;;  %s238_s24 = sshll.u32 %s193_s20, 4  ;;  %s719_s24 = int_to_ptr.vmem [resolvable:$true] %s238_s24 }
  0x42   : > { %s347_s27 = sld [smem:[#allocation2 + $0x2]]  ;;  %s350_s4 = sshll.u32 %s555_s12, 7 }
  0x43   : > { %432 = vlog2.f32 %v202_v2  ;;  %s348_s19 = sld [smem:[#allocation2 + $0x3]]  ;;  %s724_s5 = scalar_lea.hbm %s774_s2, %s350_s4 }
  0x44   : > { %434 = vlog2.f32 %v203_v3  ;;  %s223_s7 = scalar_lea.sflag [#allocation4], %s710_s3  ;;  %s479_s6 = scalar_lea.vmem %s719_s24, 256 }
  0x45   : > { %p480_p3 = scmp.ne.s32.totalorder %s719_s24, %s479_s6  ;;  %p785_p7 = scmp.ne.s32.totalorder %s779_s21, 0 }
  0x46   : > { %v208_v5 = vstv %s196_s18  ;;  %s570_s12 = smov [#allocation7]  }
  0x47   : > { %v211_v8 = vstv %s346_s26  ;;  %p481_p12 = pnand %p480_p3, %p785_p7  ;;  %s483_s17 = sshll.u32 %s570_s12, 4  ;;  %s484_s17 = int_to_ptr.vmem [resolvable:$false] %s483_s17 }
  0x48   : > { %v214_v11 = vstv %s347_s27  ;;  %s485_s8 = scalar_lea.vmem %s484_s17, 512  ;;  %p486_p1 = scmp.lt.s32.totalorder %s719_s24, %s484_s17 }
  0x49   : > { %v217_v14 = vstv %s348_s19  ;;  %p482_p2 = pneg %p481_p12  ;;  %p487_p10 = scmp.lt.s32.totalorder %s485_s8, %s479_s6 }
  0x4b   : > { %p488_p8 = por %p487_p10, %p486_p1 }
  0x4d   : > { %p489_p9 = pnand %p488_p8, %p482_p2 }
  0x50   : > { %v433_v4 = vpop.eup %432 }
  0x51   : > { %v435_v6 = vpop.eup %434  ;;  %v205_v7 = vmul.f32 0.6931472, %v433_v4 }
  0x52   : > { %v207_v9 = vmul.f32 0.6931472, %v435_v6 }
  0x53   : > { %v209_v10 = vmul.f32 %v208_v5, %v205_v7 }
  0x54   : > { %v210_v12 = vmul.f32 %v208_v5, %v207_v9 }
  0x55   : > { %v212_v13 = vadd.f32 %v211_v8, %v209_v10 }
  0x56   : > { %v213_v15 = vadd.f32 %v211_v8, %v210_v12 }
  0x57   : > { %v215_v16 = vmax.f32 %v214_v11, %v212_v13 }
  0x58   : > { %v216_v17 = vmax.f32 %v214_v11, %v213_v15 }
  0x59   : > { %v218_v18 = vmin.f32 %v217_v14, %v215_v16 }
  0x5a   : > { %v219_v19 = vmin.f32 %v217_v14, %v216_v17 }
  0x5b   : > { %220 = vst [vmem:[%s193_s20] sm:$0xff] %v218_v18 }
  0x5c   : > { %221 = vst [vmem:[%s193_s20 + $0x8] sm:$0xff] %v219_v19 }
  0x5d   : > { %492 = shalt.err (!%p489_p9)
}
  0x5e   : > { %s493_s15 = scalar_lea.hbm %s724_s5, 256  ;;  %s497_s18 = scalar_lea.hbm %s774_s2, 512 }
  0x5f   : > { %p494_p13 = scmp.ne.s32.totalorder %s724_s5, %s493_s15  ;;  %p498_p11 = scmp.lt.s32.totalorder %s724_s5, %s774_s2 }
  0x60   : > { %p499_p5 = scmp.lt.s32.totalorder %s497_s18, %s493_s15 }
  0x61   : > { %p495_p4 = pnand %p494_p13, %p785_p7 }
  0x62   : > { %p500_p0 = por %p499_p5, %p498_p11 }
  0x63   : > { %p496_p6 = pneg %p495_p4 }
  0x65   : > { %p501_p3 = pnand %p500_p0, %p496_p6 }
  0x67   : > { %504 = shalt.err (!%p501_p3)
}
  0x68   : > { %s571_s19 = smov 128   ;;  %s572_s20 = smov 256  }
  0x69   : > { %s573_s4 = smov 8  }
  0x6a   : > { %359 = dma.vmem_to_hbm [thread:$0]  (%p785_p7), %s719_s24, 256, %s724_s5, %s223_s7, %s571_s19, %s572_s20, %s573_s4  }
  0x6b PF: > { %s253_s25 = sand.u32 1, %s543_s9   ;;  %p786_p12 = scmp.ne.s32.totalorder %s780_s22, 0 }
  0x6c   : > { %p787_p2 = scmp.ge.s32.totalorder %s563_s14, 2  ;;  %s254_s30 = scalar_lea.sflag [#allocation4], %s253_s25 }
  0x6e   : > { %p370_p1 = pnand %p787_p2, %p786_p12 }
  0x70   : > { %p371_p10 = pneg %p370_p1 }
  0x72   : > { %538 = dma.done.wait (%p371_p10), %s254_s30, 256  }
  0x73   : > { %540 = vsyncadd (%p371_p10), %s254_s30, 4294967040  ;;  %s19_s14 = sadd.s32 1, %s563_s14   ;;  %s788_s9 = smov %s547_s10 }
  0x74   : > { %p16_p8 = scmp.ge.s32.totalorder %s19_s14, 4   ;;  %s789_s10 = smov %s551_s11 }
  0x75   : > { %s790_s11 = smov %s697_s28  ;;  %s791_s12 = smov %s559_s13 }
  0x76   : > { %s792_s13 = smov %s794_s29  ;;  %18 = sbr.rel (!%p16_p8) target bundleno = 7 (0x7), region = 78 }
  0x7b   :  { %259 = vsyncpa [#allocation3], 1 }
  0x7c   :  { %261 = vsyncpa [#allocation3 + $0x1], 1 }
  0x7d   :  { %262 = vsyncpa [#allocation4], 1 }
  0x7e   :  { %264 = vsyncpa [#allocation4 + $0x1], 1 }
  0x7f   :  { %265 = vsyncpa [#allocation5], 1 }
  0x80   :  { %267 = vsyncpa [#allocation5 + $0x1], 1 }

</bundles_post_ra>
